<compile_context>
chip_gen: v7x
topology: tpu7x:2x2x1
jax: 0.10.0
libtpu: 0.0.40
codegen_flags: <defaults>
</compile_context>

<pallas_src>
import functools

import jax
import jax.numpy as jnp
import numpy as np
from jax.experimental import pallas as pl
from jax.experimental.pallas import tpu as pltpu


# ------------------------------ layout helpers --------------------------------

def _round_up(n, m):
    return ((n + m - 1) // m) * m


def _bias_layout(conv_feat, fc_out_sizes):
    """Lane-aligned (128) packing offsets for [bconv, b1, ..., bn].

    Returns ([(start, size), ...], total_padded_width)."""
    offs = [(0, conv_feat)]
    cur = _round_up(conv_feat, 128)
    for sz in fc_out_sizes:
        offs.append((cur, sz))
        cur = _round_up(cur + sz, 128)
    return offs, cur


# ------------------------------ Pallas kernel ---------------------------------

def _fused_forward_kernel(bias_offsets, F, *refs):
    """Fused conv(k2,s2,p1)+ReLU+maxpool(k2,s1)+flatten+MLP.

    refs = (ximg, A, bias_pack, w1, ..., wn, out)
      ximg     : (B, Cin*H*W)   flattened NCHW input (f32)
      A        : (Cin*H*W, 4*F) bf16 conv+pool lowering matrix; the 4 column
                                blocks are the 4 maxpool window taps, columns
                                inside a block in PyTorch channel-major order
      bias_pack: (1, total)     f32, all biases packed at 128-aligned offsets
                                given by `bias_offsets` ([bconv, b1, ..., bn])
      wi       : (in, out)      bf16 FC weights (pre-transposed; last padded
                                to 128 output lanes)
      out      : (B, out_pad)   f32 lane-dense logits (first num_classes valid)

    Dropout(p=0.2) is identity in eval mode.
    # TODO(synk): training-mode dropout (PRNG Bernoulli mask) not implemented.
    """
    x_ref, a_ref, bias_ref = refs[0], refs[1], refs[2]
    o_ref = refs[-1]
    w_refs = refs[3:-1]
    n_fc = len(w_refs)

    # conv + maxpool: one bf16 MXU matmul (f32 accumulate) producing the 4
    # pool-window candidates side by side, then a max over the 4 lane-aligned
    # blocks.  max_q relu(z_q + b) == relu(max_q z_q + b): relu is monotone and
    # the bias is identical within a pool window (depends only on the channel).
    xb = x_ref[...].astype(a_ref.dtype)
    z = jnp.dot(xb, a_ref[...], preferred_element_type=jnp.float32)
    m = z[:, 0:F]
    for q in range(1, 4):
        m = jnp.maximum(m, z[:, q * F:(q + 1) * F])
    s0, sz0 = bias_offsets[0]
    h = jnp.maximum(m + bias_ref[:, s0:s0 + sz0], 0.0)   # (B, F) channel-major

    # FC stack: ReLU on fc_layers outputs only, plain affine on last_fc.
    # Weights are bf16; activations are cast to bf16 at the MXU boundary and
    # accumulated / biased / ReLU'd in f32.
    for i in range(n_fc):
        w = w_refs[i][...]
        s, sz = bias_offsets[i + 1]
        h = jnp.dot(h.astype(w.dtype), w,
                    preferred_element_type=jnp.float32) + bias_ref[:, s:s + sz]
        if i < n_fc - 1:
            h = jnp.maximum(h, 0.0)
    o_ref[...] = h


# --------------------------- parameter preparation ----------------------------

def prepare_params(params, in_shape=(1, 16, 16), num_classes=10,
                   out_lane_pad=128, weight_dtype=jnp.bfloat16):
    """One-time (host-side) folding of conv+ReLU+maxpool+flatten into a single
    matmul operand, FC weight layout, and bias packing for the fused kernel."""
    Wc, bc = params["conv"]
    Wc = np.asarray(Wc, np.float32)
    bc = np.asarray(bc, np.float32)
    Cin, H, W = in_shape
    Cout, _, KH, KW = Wc.shape
    OH = (H + 2 - KH) // 2 + 1            # conv: stride 2, padding 1  -> 9
    OW = (W + 2 - KW) // 2 + 1
    PH, PW = OH - 1, OW - 1               # maxpool k=2, s=1           -> 8
    F = Cout * PH * PW                    # pooled features (PyTorch flatten)
    P = Cin * H * W                       # flattened image size
    # Lane alignment of the 4-way tap max and bias slice depends on this.
    assert F % 128 == 0, f"pooled feature count {F} must be a multiple of 128"

    A = np.zeros((P, 4 * F), np.float32)
    bvec = np.zeros((F,), np.float32)
    windows = ((0, 0), (0, 1), (1, 0), (1, 1))
    for c in range(Cout):
        for i in range(PH):
            for j in range(PW):
                f = c * PH * PW + i * PW + j
                bvec[f] = bc[c]
                for q, (dy, dx) in enumerate(windows):
                    oh, ow = i + dy, j + dx           # conv output tap in window
                    for ky in range(KH):
                        for kx in range(KW):
                            r = 2 * oh + ky - 1       # padding = 1
                            s = 2 * ow + kx - 1
                            if 0 <= r < H and 0 <= s < W:
                                for ci in range(Cin):
                                    p = ci * H * W + r * W + s
                                    A[p, q * F + f] += Wc[c, ci, ky, kx]

    # FC weights (pre-transposed), last layer padded to lane-dense width.
    fc_ws, fc_bs = [], []
    for Wf, bf in params["fcs"]:
        fc_ws.append(np.asarray(Wf, np.float32).T)
        fc_bs.append(np.asarray(bf, np.float32))
    Wl = np.asarray(params["last"][0], np.float32)
    bl = np.asarray(params["last"][1], np.float32)
    npad = max(out_lane_pad, num_classes)
    Wlp = np.zeros((Wl.shape[1], npad), np.float32)
    Wlp[:, :num_classes] = Wl.T
    blp = np.zeros((npad,), np.float32)
    blp[:num_classes] = bl
    fc_ws.append(Wlp)
    fc_bs.append(blp)

    # Pack all biases into one lane-aligned f32 array (single DMA operand).
    offs, total = _bias_layout(F, [w.shape[1] for w in fc_ws])
    bias_pack = np.zeros((1, total), np.float32)
    bias_pack[0, offs[0][0]:offs[0][0] + F] = bvec
    for (s, sz), b in zip(offs[1:], fc_bs):
        bias_pack[0, s:s + sz] = b

    return {"A": jnp.asarray(A, weight_dtype),
            "bias_pack": jnp.asarray(bias_pack),
            "mlp_w": [jnp.asarray(w, weight_dtype) for w in fc_ws]}


# ------------------------------- JAX wrapper -----------------------------------

@functools.partial(jax.jit, static_argnames=("num_classes",))
def forward(prep, x, num_classes=10):
    """Full torchModel.forward (eval semantics).  x: (B, Cin, H, W) NCHW."""
    B = x.shape[0]
    ximg = x.reshape(B, -1)                 # NCHW flatten (contiguous, ~free)
    A = prep["A"]
    bias_pack = prep["bias_pack"]
    ws = list(prep["mlp_w"])
    F = A.shape[1] // 4
    offs, _ = _bias_layout(F, [int(w.shape[1]) for w in ws])

    kernel = functools.partial(_fused_forward_kernel,
                               tuple((int(s), int(sz)) for s, sz in offs), F)
    args = [ximg, A, bias_pack] + ws
    out_pad = ws[-1].shape[1]

    out = pl.pallas_call(
        kernel,
        out_shape=jax.ShapeDtypeStruct((B, out_pad), jnp.float32),
        in_specs=[pl.BlockSpec(memory_space=pltpu.MemorySpace.VMEM)] * len(args),
        out_specs=pl.BlockSpec(memory_space=pltpu.MemorySpace.VMEM),
        # NOTE(v7x): at production batch sizes, add a grid over the batch/M
        # dim (tile 256-512) with compiler_params=pltpu.CompilerParams(
        #   dimension_semantics=("parallel",)), weight index_maps returning a
        # constant block (weights stay VMEM-resident) to shard across both
        # TensorCores; at B=2 a gridless single block is lowest latency.
    )(*args)
    return out[:, :num_classes]


# --------------------------- reference (pure JAX) ------------------------------

def reference_forward(params, x):
    Wc, bc = params["conv"]
    y = jax.lax.conv_general_dilated(
        x, Wc, window_strides=(2, 2), padding=((1, 1), (1, 1)),
        dimension_numbers=("NCHW", "OIHW", "NCHW"))
    y = jnp.maximum(y + bc.reshape(1, -1, 1, 1), 0.0)
    y = jax.lax.reduce_window(
        y, -jnp.inf, jax.lax.max,
        window_dimensions=(1, 1, 2, 2), window_strides=(1, 1, 1, 1),
        padding="VALID")
    h = y.reshape(y.shape[0], -1)
    for (Wf, bf) in params["fcs"]:
        h = jnp.maximum(h @ Wf.T + bf, 0.0)
    Wl, bl = params["last"]
    return h @ Wl.T + bl


# ------------------------------- param init ------------------------------------

def init_params(key, in_channels=1, out_channels=4, n_hidden_layers=2,
                conv_feat=256, num_classes=10):
    ks = jax.random.split(key, 2 + 2 * (n_hidden_layers + 1))
    it = iter(ks)

    def uniform(k, shape, fan_in):
        bound = 1.0 / jnp.sqrt(float(fan_in))
        return jax.random.uniform(k, shape, jnp.float32, -bound, bound)

    # Conv2d(in_channels, out_channels, kernel_size=2)
    Wc = uniform(next(it), (out_channels, in_channels, 2, 2), in_channels * 4)
    bc = uniform(next(it), (out_channels,), in_channels * 4)

    fcs = []
    n_in, n_out = conv_feat, 256
    for _ in range(n_hidden_layers):
        Wf = uniform(next(it), (int(n_out), int(n_in)), int(n_in))
        bf = uniform(next(it), (int(n_out),), int(n_in))
        fcs.append((Wf, bf))
        n_in, n_out = n_out, n_out / 2

    Wl = uniform(next(it), (num_classes, int(n_in)), int(n_in))
    bl = uniform(next(it), (num_classes,), int(n_in))
    return {"conv": (Wc, bc), "fcs": fcs, "last": (Wl, bl)}


# ---------------------------------- main -----------------------------------------

if __name__ == "__main__":
    B, Cin, H, W = 2, 1, 16, 16          # input_shape=(1, 16, 16), batch=2
    num_classes = 10
    n_hidden_layers = 2                  # config['n_hidden_layers']

    # conv output: (16+2-2)//2+1 = 9 ; maxpool(2, stride 1): 8 ; feats = 4*8*8 = 256
    conv_feat = 4 * 8 * 8

    key = jax.random.PRNGKey(0)
    kp, kx = jax.random.split(key)
    params = init_params(kp, in_channels=Cin, out_channels=4,
                         n_hidden_layers=n_hidden_layers,
                         conv_feat=conv_feat, num_classes=num_classes)
    prep = prepare_params(params, in_shape=(Cin, H, W), num_classes=num_classes)
    x = jax.random.normal(kx, (B, Cin, H, W), jnp.float32)

    out = jax.block_until_ready(forward(prep, x))
    ref = jax.block_until_ready(reference_forward(params, x))

    assert out.shape == (B, num_classes), out.shape
    # Tolerance loosened vs the f32 reference because constant operands are
    # stored in bfloat16 (matmuls accumulate in f32).
    assert jnp.allclose(out, ref, atol=5e-2, rtol=5e-2), (
        f"max abs err {jnp.max(jnp.abs(out - ref))}")
    print("KERNEL_OK")
</pallas_src>

<mosaic_0001>
module attributes {stable_mosaic.version = 11 : i64} {
  func.func @_fused_forward_kernel(%arg0: memref<2x256xf32, #tpu.memory_space<vmem>>, %arg1: memref<256x1024xbf16, #tpu.memory_space<vmem>>, %arg2: memref<1x768xf32, #tpu.memory_space<vmem>>, %arg3: memref<256x256xbf16, #tpu.memory_space<vmem>>, %arg4: memref<256x128xbf16, #tpu.memory_space<vmem>>, %arg5: memref<128x128xbf16, #tpu.memory_space<vmem>>, %arg6: memref<2x128xf32, #tpu.memory_space<vmem>>) attributes {dimension_semantics = [], scalar_prefetch = 0 : i64, scratch_operands = 0 : i64, tpu.core_type = #tpu.core_type<tc>} {
    %c0 = arith.constant 0 : index
    %c0_0 = arith.constant 0 : index
    %0 = vector.load %arg0[%c0, %c0_0] : memref<2x256xf32, #tpu.memory_space<vmem>>, vector<2x256xf32>
    %1 = arith.truncf %0 : vector<2x256xf32> to vector<2x256xbf16>
    %c0_1 = arith.constant 0 : index
    %c0_2 = arith.constant 0 : index
    %2 = vector.load %arg1[%c0_1, %c0_2] : memref<256x1024xbf16, #tpu.memory_space<vmem>>, vector<256x1024xbf16>
    %cst = arith.constant dense<0.000000e+00> : vector<2x1024xf32>
    %3 = tpu.matmul %1, %2, %cst {dimension_numbers = #tpu.dot_dimension_numbers<[1], [0], [0], [1], [0, 0, 1, 1], [], []>} : vector<2x256xbf16>, vector<256x1024xbf16>, vector<2x1024xf32> -> vector<2x1024xf32>
    %4 = vector.extract_strided_slice %3 {offsets = [0, 0], sizes = [2, 256], strides = [1, 1]} : vector<2x1024xf32> to vector<2x256xf32>
    %5 = vector.extract_strided_slice %3 {offsets = [0, 256], sizes = [2, 256], strides = [1, 1]} : vector<2x1024xf32> to vector<2x256xf32>
    %6 = arith.maximumf %4, %5 : vector<2x256xf32>
    %7 = vector.extract_strided_slice %3 {offsets = [0, 512], sizes = [2, 256], strides = [1, 1]} : vector<2x1024xf32> to vector<2x256xf32>
    %8 = arith.maximumf %6, %7 : vector<2x256xf32>
    %9 = vector.extract_strided_slice %3 {offsets = [0, 768], sizes = [2, 256], strides = [1, 1]} : vector<2x1024xf32> to vector<2x256xf32>
    %10 = arith.maximumf %8, %9 : vector<2x256xf32>
    %c0_3 = arith.constant 0 : index
    %c0_4 = arith.constant 0 : index
    %11 = vector.load %arg2[%c0_3, %c0_4] : memref<1x768xf32, #tpu.memory_space<vmem>>, vector<1x256xf32>
    %12 = vector.broadcast %11 : vector<1x256xf32> to vector<2x256xf32>
    %13 = arith.addf %10, %12 : vector<2x256xf32>
    %cst_5 = arith.constant 0.000000e+00 : f32
    %14 = vector.broadcast %cst_5 : f32 to vector<2x256xf32>
    %15 = arith.maximumf %13, %14 : vector<2x256xf32>
    %c0_6 = arith.constant 0 : index
    %c0_7 = arith.constant 0 : index
    %16 = vector.load %arg3[%c0_6, %c0_7] : memref<256x256xbf16, #tpu.memory_space<vmem>>, vector<256x256xbf16>
    %17 = arith.truncf %15 : vector<2x256xf32> to vector<2x256xbf16>
    %cst_8 = arith.constant dense<0.000000e+00> : vector<2x256xf32>
    %18 = tpu.matmul %17, %16, %cst_8 {dimension_numbers = #tpu.dot_dimension_numbers<[1], [0], [0], [1], [0, 0, 1, 1], [], []>} : vector<2x256xbf16>, vector<256x256xbf16>, vector<2x256xf32> -> vector<2x256xf32>
    %c0_9 = arith.constant 0 : index
    %c256 = arith.constant 256 : index
    %19 = vector.load %arg2[%c0_9, %c256] : memref<1x768xf32, #tpu.memory_space<vmem>>, vector<1x256xf32>
    %20 = vector.broadcast %19 : vector<1x256xf32> to vector<2x256xf32>
    %21 = arith.addf %18, %20 : vector<2x256xf32>
    %cst_10 = arith.constant 0.000000e+00 : f32
    %22 = vector.broadcast %cst_10 : f32 to vector<2x256xf32>
    %23 = arith.maximumf %21, %22 : vector<2x256xf32>
    %c0_11 = arith.constant 0 : index
    %c0_12 = arith.constant 0 : index
    %24 = vector.load %arg4[%c0_11, %c0_12] : memref<256x128xbf16, #tpu.memory_space<vmem>>, vector<256x128xbf16>
    %25 = arith.truncf %23 : vector<2x256xf32> to vector<2x256xbf16>
    %cst_13 = arith.constant dense<0.000000e+00> : vector<2x128xf32>
    %26 = tpu.matmul %25, %24, %cst_13 {dimension_numbers = #tpu.dot_dimension_numbers<[1], [0], [0], [1], [0, 0, 1, 1], [], []>} : vector<2x256xbf16>, vector<256x128xbf16>, vector<2x128xf32> -> vector<2x128xf32>
    %c0_14 = arith.constant 0 : index
    %c512 = arith.constant 512 : index
    %27 = vector.load %arg2[%c0_14, %c512] : memref<1x768xf32, #tpu.memory_space<vmem>>, vector<1x128xf32>
    %28 = vector.broadcast %27 : vector<1x128xf32> to vector<2x128xf32>
    %29 = arith.addf %26, %28 : vector<2x128xf32>
    %cst_15 = arith.constant 0.000000e+00 : f32
    %30 = vector.broadcast %cst_15 : f32 to vector<2x128xf32>
    %31 = arith.maximumf %29, %30 : vector<2x128xf32>
    %c0_16 = arith.constant 0 : index
    %c0_17 = arith.constant 0 : index
    %32 = vector.load %arg5[%c0_16, %c0_17] : memref<128x128xbf16, #tpu.memory_space<vmem>>, vector<128x128xbf16>
    %33 = arith.truncf %31 : vector<2x128xf32> to vector<2x128xbf16>
    %cst_18 = arith.constant dense<0.000000e+00> : vector<2x128xf32>
    %34 = tpu.matmul %33, %32, %cst_18 {dimension_numbers = #tpu.dot_dimension_numbers<[1], [0], [0], [1], [0, 0, 1, 1], [], []>} : vector<2x128xbf16>, vector<128x128xbf16>, vector<2x128xf32> -> vector<2x128xf32>
    %c0_19 = arith.constant 0 : index
    %c640 = arith.constant 640 : index
    %35 = vector.load %arg2[%c0_19, %c640] : memref<1x768xf32, #tpu.memory_space<vmem>>, vector<1x128xf32>
    %36 = vector.broadcast %35 : vector<1x128xf32> to vector<2x128xf32>
    %37 = arith.addf %34, %36 : vector<2x128xf32>
    %c0_20 = arith.constant 0 : index
    %c0_21 = arith.constant 0 : index
    %38 = vector.load %arg6[%c0_20, %c0_21] : memref<2x128xf32, #tpu.memory_space<vmem>>, vector<2x128xf32>
    tpu.vector_store %arg6[%c0_20, %c0_21], %37 {strides = array<i32>} : memref<2x128xf32, #tpu.memory_space<vmem>>, vector<2x128xf32>,
    return
  }
}

</mosaic_0001>

<bundles_post_ra>
// kernel: forward.1
= control target key start
LH: loop header
LB: loop body
LE: loop exit
PB: predicated region body
PF: predicated region fallthrough
CT: control target
= control target key end

     0   :  { %11 = vsyncpa [#allocation3], 0  ;;  %s2187_s0 = inlined_call_operand.vmem [shape: f32[2,256], index: 0, kind: input, shape index: {}]   ;;  %s2188_s1 = inlined_call_operand.hbm [shape: bf16[256,1024], index: 1, kind: input, shape index: {}]   ;;  %s2189_s2 = inlined_call_operand.vmem [shape: f32[1,768], index: 2, kind: input, shape index: {}]   ;;  %s2190_s3 = inlined_call_operand.hbm [shape: bf16[256,256], index: 3, kind: input, shape index: {}]   ;;  %s2191_s4 = inlined_call_operand.hbm [shape: bf16[256,128], index: 4, kind: input, shape index: {}]   ;;  %s2192_s5 = inlined_call_operand.hbm [shape: bf16[128,128], index: 5, kind: input, shape index: {}]   ;;  %s2193_s6 = inlined_call_operand.hbm [shape: f32[2,128], index: 6, kind: output, shape index: {}]  }
   0x1   :  { %12 = vsyncpa [#allocation6], 0 }
   0x2   :  { %13 = vsyncpa [#allocation9], 0 }
   0x3   :  { %14 = vsyncpa [#allocation4], 0  ;;  %s2046_s21 = smov [#allocation5]   ;;  %s1928_s25 = scalar_lea.hbm %s2190_s3, 4096 }
   0x4   :  { %s36_s22 = sshll.u32 %s2046_s21, 4  ;;  %p1929_p0 = scmp.ne.s32.totalorder %s2190_s3, %s1928_s25  ;;  %s37_s22 = int_to_ptr.vmem [resolvable:$true] %s36_s22 }
   0x5   :  { %p1932_p1 = scmp.lt.u32.totalorder %s1928_s25, %s2190_s3 }
   0x7   :  { %p1934_p2 = pnand %p1932_p1, %p1929_p0 }
   0x9   :  { %1937 = shalt.err (!%p1934_p2)
}
   0xa   :  { %s1938_s30 = scalar_lea.vmem %s37_s22, 4096  ;;  %p1943_p4 = scmp.lt.s32.totalorder %s37_s22, %s37_s22 }
   0xb   :  { %p1939_p3 = scmp.ne.s32.totalorder %s37_s22, %s1938_s30  ;;  %p1944_p5 = scmp.lt.s32.totalorder %s1938_s30, %s1938_s30 }
   0xd   :  { %p1945_p6 = por %p1944_p5, %p1943_p4 }
   0xf   :  { %p1946_p7 = pnand %p1945_p6, %p1939_p3 }
  0x11   :  { %1949 = shalt.err (!%p1946_p7)
}
  0x12   :  { %s2047_s7 = smov 128   ;;  %s2048_s8 = smov 8  }
  0x13   :  { %42 = dma.hbm_to_vmem [thread:$0]  %s2190_s3, 4096, %s37_s22, [#allocation6], %s2047_s7, %s2047_s7, %s2048_s8  }
  0x14   :  { %s2049_s11 = smov [#allocation2]   ;;  %s1950_s15 = scalar_lea.hbm %s2188_s1, 16384 }
  0x15   :  { %s22_s12 = sshll.u32 %s2049_s11, 4  ;;  %p1951_p8 = scmp.ne.s32.totalorder %s2188_s1, %s1950_s15  ;;  %s23_s12 = int_to_ptr.vmem [resolvable:$true] %s22_s12 }
  0x16   :  { %p1954_p9 = scmp.lt.u32.totalorder %s1950_s15, %s2188_s1 }
  0x18   :  { %p1956_p10 = pnand %p1954_p9, %p1951_p8 }
  0x1a   :  { %1959 = shalt.err (!%p1956_p10)
}
  0x1b   :  { %s1960_s20 = scalar_lea.vmem %s23_s12, 16384  ;;  %p1965_p12 = scmp.lt.s32.totalorder %s23_s12, %s23_s12 }
  0x1c   :  { %p1961_p11 = scmp.ne.s32.totalorder %s23_s12, %s1960_s20  ;;  %p1966_p13 = scmp.lt.s32.totalorder %s1960_s20, %s1960_s20 }
  0x1e   :  { %p1967_p0 = por %p1966_p13, %p1965_p12 }
  0x20   :  { %p1968_p1 = pnand %p1967_p0, %p1961_p11 }
  0x22   :  { %1971 = shalt.err (!%p1968_p1)
}
  0x23   :  { %s2050_s3 = smov 512   ;;  %s2051_s21 = smov 32  }
  0x24   :  { %28 = dma.hbm_to_vmem [thread:$0]  %s2188_s1, 16384, %s23_s12, [#allocation3], %s2050_s3, %s2050_s3, %s2051_s21  }
  0x25   :  { %s2052_s24 = smov [#allocation7]   ;;  %s1972_s28 = scalar_lea.hbm %s2191_s4, 2048 }
  0x26   :  { %s48_s25 = sshll.u32 %s2052_s24, 4  ;;  %p1973_p2 = scmp.ne.s32.totalorder %s2191_s4, %s1972_s28  ;;  %s49_s25 = int_to_ptr.vmem [resolvable:$true] %s48_s25 }
  0x27   :  { %p1976_p3 = scmp.lt.u32.totalorder %s1972_s28, %s2191_s4 }
  0x29   :  { %p1978_p4 = pnand %p1976_p3, %p1973_p2 }
  0x2b   :  { %1981 = shalt.err (!%p1978_p4)
}
  0x2c   :  { %s1982_s9 = scalar_lea.vmem %s49_s25, 2048  ;;  %p1987_p6 = scmp.lt.s32.totalorder %s49_s25, %s49_s25 }
  0x2d   :  { %p1983_p5 = scmp.ne.s32.totalorder %s49_s25, %s1982_s9  ;;  %p1988_p7 = scmp.lt.s32.totalorder %s1982_s9, %s1982_s9 }
  0x2f   :  { %p1989_p8 = por %p1988_p7, %p1987_p6 }
  0x31   :  { %p1990_p9 = pnand %p1989_p8, %p1983_p5 }
  0x33   :  { %1993 = shalt.err (!%p1990_p9)
}
  0x34   :  { %s2053_s1 = smov 64   ;;  %s2054_s10 = smov 4  }
  0x35   :  { %54 = dma.hbm_to_vmem [thread:$0]  %s2191_s4, 2048, %s49_s25, [#allocation6], %s2053_s1, %s2053_s1, %s2054_s10  }
  0x36   :  { %s2055_s13 = smov [#allocation8]   ;;  %s1994_s17 = scalar_lea.hbm %s2192_s5, 1024 }
  0x37   :  { %s60_s14 = sshll.u32 %s2055_s13, 4  ;;  %p1995_p10 = scmp.ne.s32.totalorder %s2192_s5, %s1994_s17  ;;  %s61_s14 = int_to_ptr.vmem [resolvable:$true] %s60_s14 }
  0x38   :  { %p1998_p11 = scmp.lt.u32.totalorder %s1994_s17, %s2192_s5 }
  0x3a   :  { %p2000_p12 = pnand %p1998_p11, %p1995_p10 }
  0x3c   :  { %2003 = shalt.err (!%p2000_p12)
}
  0x3d   :  { %s2004_s21 = scalar_lea.vmem %s61_s14, 1024  ;;  %p2009_p0 = scmp.lt.s32.totalorder %s61_s14, %s61_s14 }
  0x3e   :  { %p2005_p13 = scmp.ne.s32.totalorder %s61_s14, %s2004_s21  ;;  %p2010_p1 = scmp.lt.s32.totalorder %s2004_s21, %s2004_s21 }
  0x40   :  { %p2011_p2 = por %p2010_p1, %p2009_p0 }
  0x42   :  { %p2012_p3 = pnand %p2011_p2, %p2005_p13 }
  0x44   :  { %2015 = shalt.err (!%p2012_p3)
}
  0x45   :  { %66 = dma.hbm_to_vmem [thread:$0]  %s2192_s5, 1024, %s61_s14, [#allocation9], %s2053_s1, %s2053_s1, %s2054_s10  }
  0x46   :  { %2038 = dma.done.wait [#allocation3], 16384  }
  0x47   :  { %2039 = vsyncadd [#allocation3], 4294950912 }
  0x48   :  { %2040 = dma.done.wait [#allocation6], 6144  }
  0x49   :  { %2041 = vsyncadd [#allocation6], 4294961152 }
  0x4a   :  { %2042 = dma.done.wait [#allocation9], 1024  }
  0x4b   :  { %2043 = vsyncadd [#allocation9], 4294966272  ;;  %v94_v0 = vld [vmem:[#allocation2] sm:$0xff]  ;;  %v95_v2 = vld [vmem:[#allocation2 + $0x8] sm:$0xff]  ;;  %vm2057_vm0 = vmmov 0   ;;  %s2058_s7 = smov [#allocation10]  }
  0x4c   :  { %v98_v1 = vld [vmem:[#allocation2 + $0x20] sm:$0xff]  ;;  %v99_v4 = vld [vmem:[#allocation2 + $0x28] sm:$0xff]  ;;  %s1594_s8 = sshll.u32 %s2058_s7, 4  ;;  %s1595_s8 = int_to_ptr.vmem [resolvable:$true] %s1594_s8 }
  0x4d   :  { %v1607_v3 = vcombine.high %v94_v0, %v98_v1  ;;  %v1606_v5 = vcombine.low %v94_v0, %v98_v1  ;;  %v102_v6 = vld [vmem:[#allocation2 + $0x40] sm:$0xff]  ;;  %v1609_v8 = vcombine.high %v95_v2, %v99_v4  ;;  %v1608_v9 = vcombine.low %v95_v2, %v99_v4  ;;  %v103_v11 = vld [vmem:[#allocation2 + $0x48] sm:$0xff]  ;;  %s2016_s9 = scalar_lea.vmem %s1595_s8, 32  ;;  %p2021_p5 = scmp.lt.s32.totalorder %s1595_s8, %s1595_s8 }
  0x4e   :  { %v106_v7 = vld [vmem:[#allocation2 + $0x60] sm:$0xff]  ;;  %v107_v12 = vld [vmem:[#allocation2 + $0x68] sm:$0xff]  ;;  %p2017_p4 = scmp.ne.s32.totalorder %s1595_s8, %s2016_s9  ;;  %p2022_p6 = scmp.lt.s32.totalorder %s2016_s9, %s2016_s9 }
  0x4f   :  { %v1615_v10 = vcombine.high %v102_v6, %v106_v7  ;;  %v110_v13 = vld [vmem:[#allocation2 + $0x80] sm:$0xff]  ;;  %862 = vmatprep.subr.bf16.mxu0 %v1607_v3  ;;  %v1617_v14 = vcombine.high %v103_v11, %v107_v12  ;;  %v111_v16 = vld [vmem:[#allocation2 + $0x88] sm:$0xff]  ;;  %903 = vmatprep.subr.bf16.mxu1 %v1609_v8  ;;  %v1614_v18 = vcombine.low %v102_v6, %v106_v7 }
  0x50   :  { %v114_v15 = vld [vmem:[#allocation2 + $0xa0] sm:$0xff]  ;;  %v115_v17 = vld [vmem:[#allocation2 + $0xa8] sm:$0xff]  ;;  %863 = vmatpush1.bf16.msra.mxu0 %v1606_v5  ;;  %904 = vmatpush1.bf16.msra.mxu1 %v1608_v9  ;;  %v1616_v19 = vcombine.low %v103_v11, %v107_v12  ;;  %p2023_p7 = por %p2022_p6, %p2021_p5 }
  0x51   :  { %864 = vmatprep.subr.bf16.mxu0 %v1615_v10  ;;  %v1623_v20 = vcombine.high %v110_v13, %v114_v15  ;;  %905 = vmatprep.subr.bf16.mxu1 %v1617_v14  ;;  %v1625_v21 = vcombine.high %v111_v16, %v115_v17  ;;  %v118_v22 = vld [vmem:[#allocation2 + $0xc0] sm:$0xff]  ;;  %v119_v24 = vld [vmem:[#allocation2 + $0xc8] sm:$0xff]  ;;  %v1622_v26 = vcombine.low %v110_v13, %v114_v15 }
  0x52   :  { %v122_v23 = vld [vmem:[#allocation2 + $0xe0] sm:$0xff]  ;;  %v123_v25 = vld [vmem:[#allocation2 + $0xe8] sm:$0xff]  ;;  %v1624_v27 = vcombine.low %v111_v16, %v115_v17  ;;  %p2024_p8 = pnand %p2023_p7, %p2017_p4 }
  0x53   :  { %v1631_v28 = vcombine.high %v118_v22, %v122_v23  ;;  %v1633_v29 = vcombine.high %v119_v24, %v123_v25  ;;  %v126_v30 = vld [vmem:[#allocation2 + $0x100] sm:$0xff]  ;;  %v127_v32 = vld [vmem:[#allocation2 + $0x108] sm:$0xff]  ;;  %v1630_v34 = vcombine.low %v118_v22, %v122_v23  ;;  %v1632_v35 = vcombine.low %v119_v24, %v123_v25 }
  0x54   :  { %865 = vmatpush1.bf16.msra.mxu0 %v1614_v18  ;;  %906 = vmatpush1.bf16.msra.mxu1 %v1616_v19  ;;  %v130_v31 = vld [vmem:[#allocation2 + $0x120] sm:$0xff]  ;;  %v131_v33 = vld [vmem:[#allocation2 + $0x128] sm:$0xff] }
  0x55   :  { %866 = vmatprep.subr.bf16.mxu0 %v1623_v20  ;;  %907 = vmatprep.subr.bf16.mxu1 %v1625_v21  ;;  %v1639_v36 = vcombine.high %v126_v30, %v130_v31  ;;  %v1641_v37 = vcombine.high %v127_v32, %v131_v33  ;;  %v134_v38 = vld [vmem:[#allocation2 + $0x140] sm:$0xff]  ;;  %v135_v40 = vld [vmem:[#allocation2 + $0x148] sm:$0xff]  ;;  %v1638_v42 = vcombine.low %v126_v30, %v130_v31 }
  0x56   :  { %v138_v39 = vld [vmem:[#allocation2 + $0x160] sm:$0xff]  ;;  %v139_v41 = vld [vmem:[#allocation2 + $0x168] sm:$0xff]  ;;  %v1640_v43 = vcombine.low %v127_v32, %v131_v33 }
  0x57   :  { %v1647_v44 = vcombine.high %v134_v38, %v138_v39  ;;  %v1649_v45 = vcombine.high %v135_v40, %v139_v41  ;;  %v142_v46 = vld [vmem:[#allocation2 + $0x180] sm:$0xff]  ;;  %v143_v48 = vld [vmem:[#allocation2 + $0x188] sm:$0xff]  ;;  %v1646_v50 = vcombine.low %v134_v38, %v138_v39  ;;  %v1648_v51 = vcombine.low %v135_v40, %v139_v41 }
  0x58   :  { %867 = vmatpush1.bf16.msra.mxu0 %v1622_v26  ;;  %908 = vmatpush1.bf16.msra.mxu1 %v1624_v27  ;;  %v146_v47 = vld [vmem:[#allocation2 + $0x1a0] sm:$0xff]  ;;  %v147_v49 = vld [vmem:[#allocation2 + $0x1a8] sm:$0xff] }
  0x59   :  { %868 = vmatprep.subr.bf16.mxu0 %v1631_v28  ;;  %909 = vmatprep.subr.bf16.mxu1 %v1633_v29  ;;  %v1655_v52 = vcombine.high %v142_v46, %v146_v47  ;;  %v2145_v53 = vld.sshfl [vmem:[%s2187_s0] sm:$0x33 pattern:$0x76325410]  ;;  %v1657_v54 = vcombine.high %v143_v48, %v147_v49  ;;  %v151_v58 = vld [vmem:[#allocation2 + $0x1c8] sm:$0xff]  ;;  %v1654_v60 = vcombine.low %v142_v46, %v146_v47 }
  0x5a   :  { %v150_v55 = vld [vmem:[#allocation2 + $0x1c0] sm:$0xff]  ;;  %v89_v57 = vcombine.high %v2145_v53, %v2145_v53  ;;  %v155_v59 = vld [vmem:[#allocation2 + $0x1e8] sm:$0xff]  ;;  %v1656_v62 = vcombine.low %v143_v48, %v147_v49 }
  0x5b   :  { %v154_v56 = vld [vmem:[#allocation2 + $0x1e0] sm:$0xff]  ;;  %v1665_v0 = vcombine.high %v151_v58, %v155_v59  ;;  %v159_v3 = vld [vmem:[#allocation2 + $0x208] sm:$0xff]  ;;  %v1664_v6 = vcombine.low %v151_v58, %v155_v59 }
  0x5c   :  { %869 = vmatpush1.bf16.msra.mxu0 %v1630_v34  ;;  %910 = vmatpush1.bf16.msra.mxu1 %v1632_v35  ;;  %v2149_v61 = vpack.c.bf16 %v89_v57, %v89_v57  ;;  %v1663_v63 = vcombine.high %v150_v55, %v154_v56  ;;  %v158_v1 = vld [vmem:[#allocation2 + $0x200] sm:$0xff]  ;;  %v163_v4 = vld [vmem:[#allocation2 + $0x228] sm:$0xff]  ;;  %v1662_v5 = vcombine.low %v150_v55, %v154_v56 }
  0x5d   :  { %870 = vmatprep.subr.bf16.mxu0 %v1639_v36  ;;  %911 = vmatprep.subr.bf16.mxu1 %v1641_v37  ;;  %v162_v2 = vld [vmem:[#allocation2 + $0x220] sm:$0xff]  ;;  %v1673_v8 = vcombine.high %v159_v3, %v163_v4  ;;  %v167_v11 = vld [vmem:[#allocation2 + $0x248] sm:$0xff]  ;;  %v1672_v14 = vcombine.low %v159_v3, %v163_v4  ;;  %v97_v4 = vld [vmem:[#allocation2 + $0x18] sm:$0xff] }
  0x5e   :  { %894 = vmatprep.mubr.bf16.mxu0 %v2149_v61  ;;  %935 = vmatprep.mubr.bf16.mxu1 %v2149_v61  ;;  %v1671_v7 = vcombine.high %v158_v1, %v162_v2  ;;  %v166_v9 = vld [vmem:[#allocation2 + $0x240] sm:$0xff]  ;;  %v171_v12 = vld [vmem:[#allocation2 + $0x268] sm:$0xff]  ;;  %v1670_v13 = vcombine.low %v158_v1, %v162_v2  ;;  %v100_v1 = vld [vmem:[#allocation2 + $0x30] sm:$0xff] }
  0x5f   :  { %v170_v10 = vld [vmem:[#allocation2 + $0x260] sm:$0xff]  ;;  %v1681_v16 = vcombine.high %v167_v11, %v171_v12  ;;  %v175_v19 = vld [vmem:[#allocation2 + $0x288] sm:$0xff]  ;;  %v1680_v22 = vcombine.low %v167_v11, %v171_v12  ;;  %v105_v12 = vld [vmem:[#allocation2 + $0x58] sm:$0xff] }
  0x60   :  { %871 = vmatpush1.bf16.msra.mxu0 %v1638_v42  ;;  %912 = vmatpush1.bf16.msra.mxu1 %v1640_v43  ;;  %v1679_v15 = vcombine.high %v166_v9, %v170_v10  ;;  %v174_v17 = vld [vmem:[#allocation2 + $0x280] sm:$0xff]  ;;  %v179_v20 = vld [vmem:[#allocation2 + $0x2a8] sm:$0xff]  ;;  %v1678_v21 = vcombine.low %v166_v9, %v170_v10  ;;  %v108_v9 = vld [vmem:[#allocation2 + $0x70] sm:$0xff] }
  0x61   :  { %872 = vmatprep.subr.bf16.mxu0 %v1647_v44  ;;  %913 = vmatprep.subr.bf16.mxu1 %v1649_v45  ;;  %v178_v18 = vld [vmem:[#allocation2 + $0x2a0] sm:$0xff]  ;;  %v1689_v24 = vcombine.high %v175_v19, %v179_v20  ;;  %v183_v27 = vld [vmem:[#allocation2 + $0x2c8] sm:$0xff]  ;;  %v1688_v30 = vcombine.low %v175_v19, %v179_v20 }
  0x62   :  { %v1687_v23 = vcombine.high %v174_v17, %v178_v18  ;;  %v182_v25 = vld [vmem:[#allocation2 + $0x2c0] sm:$0xff]  ;;  %v187_v28 = vld [vmem:[#allocation2 + $0x2e8] sm:$0xff]  ;;  %v1686_v29 = vcombine.low %v174_v17, %v178_v18  ;;  %v112_v17 = vld [vmem:[#allocation2 + $0x90] sm:$0xff] }
  0x63   :  { %v186_v26 = vld [vmem:[#allocation2 + $0x2e0] sm:$0xff]  ;;  %v1697_v33 = vcombine.high %v183_v27, %v187_v28  ;;  %v191_v35 = vld [vmem:[#allocation2 + $0x308] sm:$0xff]  ;;  %v1696_v40 = vcombine.low %v183_v27, %v187_v28  ;;  %v116_v18 = vld [vmem:[#allocation2 + $0xb0] sm:$0xff] }
  0x64   :  { %873 = vmatpush1.bf16.msra.mxu0 %v1646_v50  ;;  %914 = vmatpush1.bf16.msra.mxu1 %v1648_v51  ;;  %v1695_v31 = vcombine.high %v182_v25, %v186_v26  ;;  %v190_v32 = vld [vmem:[#allocation2 + $0x300] sm:$0xff]  ;;  %v195_v36 = vld [vmem:[#allocation2 + $0x328] sm:$0xff]  ;;  %v1694_v37 = vcombine.low %v182_v25, %v186_v26  ;;  %v1627_v25 = vcombine.high %v112_v17, %v116_v18  ;;  %v120_v27 = vld [vmem:[#allocation2 + $0xd0] sm:$0xff] }
  0x65   :  { %874 = vmatprep.subr.bf16.mxu0 %v1655_v52  ;;  %915 = vmatprep.subr.bf16.mxu1 %v1657_v54  ;;  %v194_v34 = vld [vmem:[#allocation2 + $0x320] sm:$0xff]  ;;  %v199_v42 = vld [vmem:[#allocation2 + $0x348] sm:$0xff]  ;;  %v1705_v44 = vcombine.high %v191_v35, %v195_v36  ;;  %v1704_v48 = vcombine.low %v191_v35, %v195_v36  ;;  %v124_v28 = vld [vmem:[#allocation2 + $0xf0] sm:$0xff] }
  0x66   :  { %v198_v38 = vld [vmem:[#allocation2 + $0x340] sm:$0xff]  ;;  %v1703_v41 = vcombine.high %v190_v32, %v194_v34  ;;  %v203_v43 = vld [vmem:[#allocation2 + $0x368] sm:$0xff]  ;;  %v1702_v45 = vcombine.low %v190_v32, %v194_v34  ;;  %v128_v35 = vld [vmem:[#allocation2 + $0x110] sm:$0xff] }
  0x67   :  { %v202_v39 = vld [vmem:[#allocation2 + $0x360] sm:$0xff]  ;;  %v207_v50 = vld [vmem:[#allocation2 + $0x388] sm:$0xff]  ;;  %v1713_v52 = vcombine.high %v199_v42, %v203_v43  ;;  %v1712_v57 = vcombine.low %v199_v42, %v203_v43  ;;  %v132_v36 = vld [vmem:[#allocation2 + $0x130] sm:$0xff] }
  0x68   :  { %875 = vmatpush1.bf16.msra.mxu0 %v1654_v60  ;;  %916 = vmatpush1.bf16.msra.mxu1 %v1656_v62  ;;  %v206_v46 = vld [vmem:[#allocation2 + $0x380] sm:$0xff]  ;;  %v1711_v49 = vcombine.high %v198_v38, %v202_v39  ;;  %v211_v51 = vld [vmem:[#allocation2 + $0x3a8] sm:$0xff]  ;;  %v1710_v54 = vcombine.low %v198_v38, %v202_v39  ;;  %v133_v38 = vld [vmem:[#allocation2 + $0x138] sm:$0xff]  ;;  %v1634_v39 = vcombine.low %v120_v27, %v124_v28 }
  0x69   :  { %876 = vmatprep.subr.bf16.mxu0 %v1663_v63  ;;  %917 = vmatprep.subr.bf16.mxu1 %v1665_v0  ;;  %v210_v47 = vld [vmem:[#allocation2 + $0x3a0] sm:$0xff]  ;;  %v215_v59 = vld [vmem:[#allocation2 + $0x3c8] sm:$0xff]  ;;  %v1721_v62 = vcombine.high %v207_v50, %v211_v51  ;;  %v96_v0 = vld [vmem:[#allocation2 + $0x10] sm:$0xff]  ;;  %v1720_v2 = vcombine.low %v207_v50, %v211_v51 }
  0x6a   :  { %v214_v55 = vld [vmem:[#allocation2 + $0x3c0] sm:$0xff]  ;;  %v1719_v58 = vcombine.high %v206_v46, %v210_v47  ;;  %v219_v60 = vld [vmem:[#allocation2 + $0x3e8] sm:$0xff]  ;;  %v1718_v63 = vcombine.low %v206_v46, %v210_v47  ;;  %v1611_v11 = vcombine.high %v96_v0, %v100_v1  ;;  %v136_v42 = vld [vmem:[#allocation2 + $0x150] sm:$0xff]  ;;  %v1642_v46 = vcombine.low %v128_v35, %v132_v36 }
  0x6b   :  { %v218_v56 = vld [vmem:[#allocation2 + $0x3e0] sm:$0xff]  ;;  %v1728_v10 = vcombine.low %v215_v59, %v219_v60  ;;  %v140_v43 = vld [vmem:[#allocation2 + $0x170] sm:$0xff] }
  0x6c   :  { %877 = vmatpush1.bf16.msra.mxu0 %v1662_v5  ;;  %918 = vmatpush1.bf16.msra.mxu1 %v1664_v6  ;;  %v1727_v3 = vcombine.high %v214_v55, %v218_v56  ;;  %v101_v5 = vld [vmem:[#allocation2 + $0x38] sm:$0xff]  ;;  %v1729_v6 = vcombine.high %v215_v59, %v219_v60  ;;  %v144_v50 = vld [vmem:[#allocation2 + $0x190] sm:$0xff] }
  0x6d   :  { %878 = vmatprep.subr.bf16.mxu0 %v1671_v7  ;;  %919 = vmatprep.subr.bf16.mxu1 %v1673_v8  ;;  %v1726_v7 = vcombine.low %v214_v55, %v218_v56  ;;  %v104_v8 = vld [vmem:[#allocation2 + $0x50] sm:$0xff]  ;;  %v1612_v19 = vcombine.low %v97_v4, %v101_v5  ;;  %v1650_v55 = vcombine.low %v136_v42, %v140_v43 }
  0x6e   :  { %v1619_v20 = vcombine.high %v104_v8, %v108_v9  ;;  %v148_v51 = vld [vmem:[#allocation2 + $0x1b0] sm:$0xff] }
  0x6f   :  { %v152_v59 = vld [vmem:[#allocation2 + $0x1d0] sm:$0xff] }
  0x70   :  { %879 = vmatpush1.bf16.msra.mxu0 %v1670_v13  ;;  %920 = vmatpush1.bf16.msra.mxu1 %v1672_v14  ;;  %v109_v13 = vld [vmem:[#allocation2 + $0x78] sm:$0xff]  ;;  %v1613_v14 = vcombine.high %v97_v4, %v101_v5  ;;  %v156_v60 = vld [vmem:[#allocation2 + $0x1f0] sm:$0xff] }
  0x71   :  { %880 = vmatprep.subr.bf16.mxu0 %v1679_v15  ;;  %921 = vmatprep.subr.bf16.mxu1 %v1681_v16  ;;  %v2155_v15 = vpack.c.bf16 %v2145_v53, %v2145_v53  ;;  %v1610_v16 = vcombine.low %v96_v0, %v100_v1  ;;  %v1620_v53 = vcombine.low %v105_v12, %v109_v13  ;;  %v160_v4 = vld [vmem:[#allocation2 + $0x210] sm:$0xff] }
  0x72   :  { %v1658_v0 = vcombine.low %v144_v50, %v148_v51  ;;  %v164_v5 = vld [vmem:[#allocation2 + $0x230] sm:$0xff] }
  0x74   :  { %881 = vmatpush1.bf16.msra.mxu0 %v1678_v21  ;;  %922 = vmatpush1.bf16.msra.mxu1 %v1680_v22  ;;  %v113_v21 = vld [vmem:[#allocation2 + $0x98] sm:$0xff] }
  0x75   :  { %882 = vmatprep.subr.bf16.mxu0 %v1687_v23  ;;  %923 = vmatprep.subr.bf16.mxu1 %v1689_v24  ;;  %v117_v22 = vld [vmem:[#allocation2 + $0xb8] sm:$0xff]  ;;  %v1621_v23 = vcombine.high %v105_v12, %v109_v13  ;;  %v1618_v24 = vcombine.low %v104_v8, %v108_v9  ;;  %v1666_v8 = vcombine.low %v152_v59, %v156_v60  ;;  %v168_v12 = vld [vmem:[#allocation2 + $0x250] sm:$0xff] }
  0x76   :  { %v1629_v26 = vcombine.high %v113_v21, %v117_v22  ;;  %v1628_v32 = vcombine.low %v113_v21, %v117_v22  ;;  %v172_v13 = vld [vmem:[#allocation2 + $0x270] sm:$0xff] }
  0x77   :  { %v176_v21 = vld [vmem:[#allocation2 + $0x290] sm:$0xff] }
  0x78   :  { %883 = vmatpush1.bf16.msra.mxu0 %v1686_v29  ;;  %924 = vmatpush1.bf16.msra.mxu1 %v1688_v30  ;;  %v121_v29 = vld [vmem:[#allocation2 + $0xd8] sm:$0xff]  ;;  %v180_v22 = vld [vmem:[#allocation2 + $0x2b0] sm:$0xff] }
  0x79   :  { %884 = vmatprep.subr.bf16.mxu0 %v1695_v31  ;;  %925 = vmatprep.subr.bf16.mxu1 %v1697_v33  ;;  %v125_v30 = vld [vmem:[#allocation2 + $0xf8] sm:$0xff]  ;;  %v1626_v31 = vcombine.low %v112_v17, %v116_v18  ;;  %v1635_v33 = vcombine.high %v120_v27, %v124_v28  ;;  %v1674_v17 = vcombine.low %v160_v4, %v164_v5  ;;  %v184_v28 = vld [vmem:[#allocation2 + $0x2d0] sm:$0xff] }
  0x7a   :  { %v1637_v34 = vcombine.high %v121_v29, %v125_v30 }
  0x7c   :  { %885 = vmatpush1.bf16.msra.mxu0 %v1694_v37  ;;  %926 = vmatpush1.bf16.msra.mxu1 %v1696_v40  ;;  %v129_v37 = vld [vmem:[#allocation2 + $0x118] sm:$0xff]  ;;  %v1636_v40 = vcombine.low %v121_v29, %v125_v30  ;;  %v188_v29 = vld [vmem:[#allocation2 + $0x2f0] sm:$0xff] }
  0x7d   :  { %886 = vmatprep.subr.bf16.mxu0 %v1703_v41  ;;  %927 = vmatprep.subr.bf16.mxu1 %v1705_v44  ;;  %v1643_v41 = vcombine.high %v128_v35, %v132_v36  ;;  %v137_v44 = vld [vmem:[#allocation2 + $0x158] sm:$0xff]  ;;  %v1644_v47 = vcombine.low %v129_v37, %v133_v38  ;;  %v192_v36 = vld [vmem:[#allocation2 + $0x310] sm:$0xff] }
  0x7e   :  { %v185_v30 = vld [vmem:[#allocation2 + $0x2d8] sm:$0xff] }
  0x80   :  { %887 = vmatpush1.bf16.msra.mxu0 %v1702_v45  ;;  %928 = vmatpush1.bf16.msra.mxu1 %v1704_v48  ;;  %v141_v45 = vld [vmem:[#allocation2 + $0x178] sm:$0xff]  ;;  %v1651_v48 = vcombine.high %v136_v42, %v140_v43  ;;  %v200_v43 = vld [vmem:[#allocation2 + $0x350] sm:$0xff] }
  0x81   :  { %888 = vmatprep.subr.bf16.mxu0 %v1711_v49  ;;  %929 = vmatprep.subr.bf16.mxu1 %v1713_v52  ;;  %v1653_v49 = vcombine.high %v137_v44, %v141_v45  ;;  %v145_v52 = vld [vmem:[#allocation2 + $0x198] sm:$0xff]  ;;  %v1652_v56 = vcombine.low %v137_v44, %v141_v45  ;;  %v204_v44 = vld [vmem:[#allocation2 + $0x370] sm:$0xff] }
  0x82   :  { %v201_v45 = vld [vmem:[#allocation2 + $0x358] sm:$0xff] }
  0x84   :  { %889 = vmatpush1.bf16.msra.mxu0 %v1710_v54  ;;  %930 = vmatpush1.bf16.msra.mxu1 %v1712_v57  ;;  %v149_v54 = vld [vmem:[#allocation2 + $0x1b8] sm:$0xff]  ;;  %v1659_v57 = vcombine.high %v144_v50, %v148_v51  ;;  %v208_v51 = vld [vmem:[#allocation2 + $0x390] sm:$0xff] }
  0x85   :  { %890 = vmatprep.subr.bf16.mxu0 %v1719_v58  ;;  %931 = vmatprep.subr.bf16.mxu1 %v1721_v62  ;;  %v1661_v58 = vcombine.high %v145_v52, %v149_v54  ;;  %v153_v62 = vld [vmem:[#allocation2 + $0x1d8] sm:$0xff]  ;;  %v1660_v1 = vcombine.low %v145_v52, %v149_v54  ;;  %v212_v52 = vld [vmem:[#allocation2 + $0x3b0] sm:$0xff] }
  0x86   :  { %v209_v54 = vld [vmem:[#allocation2 + $0x398] sm:$0xff] }
  0x88   :  { %891 = vmatpush1.bf16.msra.mxu0 %v1718_v63  ;;  %932 = vmatpush1.bf16.msra.mxu1 %v1720_v2  ;;  %v157_v63 = vld [vmem:[#allocation2 + $0x1f8] sm:$0xff]  ;;  %v1667_v2 = vcombine.high %v152_v59, %v156_v60  ;;  %v216_v60 = vld [vmem:[#allocation2 + $0x3d0] sm:$0xff] }
  0x89   :  { %892 = vmatprep.subr.bf16.mxu0 %v1727_v3  ;;  %933 = vmatprep.subr.bf16.mxu1 %v1729_v6  ;;  %v1669_v3 = vcombine.high %v153_v62, %v157_v63  ;;  %v161_v6 = vld [vmem:[#allocation2 + $0x218] sm:$0xff]  ;;  %v1668_v9 = vcombine.low %v153_v62, %v157_v63  ;;  %v220_v62 = vld [vmem:[#allocation2 + $0x3f0] sm:$0xff] }
  0x8a   :  { %v217_v63 = vld [vmem:[#allocation2 + $0x3d8] sm:$0xff] }
  0x8c   :  { %893 = vmatpush1.bf16.msra.mxu0 %v1726_v7  ;;  %934 = vmatpush1.bf16.msra.mxu1 %v1728_v10  ;;  %v165_v7 = vld [vmem:[#allocation2 + $0x238] sm:$0xff]  ;;  %v1675_v10 = vcombine.high %v160_v4, %v164_v5  ;;  %v1730_v5 = vcombine.low %v216_v60, %v220_v62 }
  0x8d   :  { %944 = vmatprep.subr.bf16.mxu0 %v1611_v11  ;;  %985 = vmatprep.subr.bf16.mxu1 %v1613_v14  ;;  %v1677_v11 = vcombine.high %v161_v6, %v165_v7  ;;  %v169_v14 = vld [vmem:[#allocation2 + $0x258] sm:$0xff]  ;;  %v1676_v18 = vcombine.low %v161_v6, %v165_v7  ;;  %v1856_v7 = vld [vmem:[#allocation5] ss:$8 sps:$4 sm:$0xff]  }
  0x8f   :  { %895 = vmatmul.mubr.bf16.vlgmr.msra.gmra.mrb[0].mxu0 %v2155_v15  ;;  %936 = vmatmul.mubr.bf16.vlgmr.msra.gmra.mrb[0].mxu1 %v2155_v15 }
  0x90   :  { %945 = vmatpush1.bf16.msra.mxu0 %v1610_v16  ;;  %986 = vmatpush1.bf16.msra.mxu1 %v1612_v19  ;;  %v173_v16 = vld [vmem:[#allocation2 + $0x278] sm:$0xff]  ;;  %v1683_v19 = vcombine.high %v168_v12, %v172_v13 }
  0x91   :  { %946 = vmatprep.subr.bf16.mxu0 %v1619_v20  ;;  %987 = vmatprep.subr.bf16.mxu1 %v1621_v23  ;;  %v1685_v20 = vcombine.high %v169_v14, %v173_v16  ;;  %v177_v23 = vld [vmem:[#allocation2 + $0x298] sm:$0xff] }
  0x92   :  { %976 = vmatprep.mubr.bf16.mxu0 %v2149_v61  ;;  %1017 = vmatprep.mubr.bf16.mxu1 %v2149_v61  ;;  %v1645_v61 = vcombine.high %v129_v37, %v133_v38  ;;  %v196_v37 = vld [vmem:[#allocation2 + $0x330] sm:$0xff]  ;;  %v193_v38 = vld [vmem:[#allocation2 + $0x318] sm:$0xff] }
  0x94   :  { %947 = vmatpush1.bf16.msra.mxu0 %v1618_v24  ;;  %988 = vmatpush1.bf16.msra.mxu1 %v1620_v53  ;;  %v181_v24 = vld [vmem:[#allocation2 + $0x2b8] sm:$0xff]  ;;  %v1682_v53 = vcombine.low %v168_v12, %v172_v13  ;;  %v1862_v12 = vld [vmem:[#allocation5 + $0x20] ss:$8 sps:$4 sm:$0xff]  }
  0x95   :  { %948 = vmatprep.subr.bf16.mxu0 %v1627_v25  ;;  %989 = vmatprep.subr.bf16.mxu1 %v1629_v26  ;;  %v1684_v25 = vcombine.low %v169_v14, %v173_v16  ;;  %v1691_v26 = vcombine.high %v176_v21, %v180_v22  ;;  %v1693_v27 = vcombine.high %v177_v23, %v181_v24  ;;  %v1867_v13 = vld [vmem:[#allocation5 + $0x34] ss:$8 sps:$4 sm:$0xff]   ;;  %v1865_v14 = vld [vmem:[#allocation5 + $0x30] ss:$8 sps:$4 sm:$0xff]   ;;  %v1870_v16 = vld [vmem:[#allocation5 + $0x44] ss:$8 sps:$4 sm:$0xff]  }
  0x98   :  { %949 = vmatpush1.bf16.msra.mxu0 %v1626_v31  ;;  %990 = vmatpush1.bf16.msra.mxu1 %v1628_v32  ;;  %v189_v31 = vld [vmem:[#allocation2 + $0x2f8] sm:$0xff]  ;;  %v1690_v32 = vcombine.low %v176_v21, %v180_v22 }
  0x99   :  { %950 = vmatprep.subr.bf16.mxu0 %v1635_v33  ;;  %991 = vmatprep.subr.bf16.mxu1 %v1637_v34  ;;  %v1692_v33 = vcombine.low %v177_v23, %v181_v24  ;;  %v1699_v34 = vcombine.high %v184_v28, %v188_v29  ;;  %v1701_v35 = vcombine.high %v185_v30, %v189_v31  ;;  %v1879_v21 = vld [vmem:[#allocation5 + $0x74] ss:$8 sps:$4 sm:$0xff]   ;;  %v1877_v22 = vld [vmem:[#allocation5 + $0x70] ss:$8 sps:$4 sm:$0xff]   ;;  %v1882_v23 = vld [vmem:[#allocation5 + $0x84] ss:$8 sps:$4 sm:$0xff]  }
  0x9a   :  { %v1880_v24 = vld [vmem:[#allocation5 + $0x80] ss:$8 sps:$4 sm:$0xff]  }
  0x9c   :  { %951 = vmatpush1.bf16.msra.mxu0 %v1634_v39  ;;  %992 = vmatpush1.bf16.msra.mxu1 %v1636_v40  ;;  %v197_v39 = vld [vmem:[#allocation2 + $0x338] sm:$0xff]  ;;  %v1698_v40 = vcombine.low %v184_v28, %v188_v29 }
  0x9d   :  { %952 = vmatprep.subr.bf16.mxu0 %v1643_v41  ;;  %993 = vmatprep.subr.bf16.mxu1 %v1645_v61  ;;  %v1700_v41 = vcombine.low %v185_v30, %v189_v31  ;;  %v1707_v61 = vcombine.high %v192_v36, %v196_v37  ;;  %v1709_v42 = vcombine.high %v193_v38, %v197_v39  ;;  %v1891_v28 = vld [vmem:[#allocation5 + $0xb4] ss:$8 sps:$4 sm:$0xff]   ;;  %v1889_v29 = vld [vmem:[#allocation5 + $0xb0] ss:$8 sps:$4 sm:$0xff]   ;;  %v1894_v30 = vld [vmem:[#allocation5 + $0xc4] ss:$8 sps:$4 sm:$0xff]  }
  0x9e   :  { %v1892_v31 = vld [vmem:[#allocation5 + $0xc0] ss:$8 sps:$4 sm:$0xff]  }
  0xa0   :  { %953 = vmatpush1.bf16.msra.mxu0 %v1642_v46  ;;  %994 = vmatpush1.bf16.msra.mxu1 %v1644_v47  ;;  %v205_v46 = vld [vmem:[#allocation2 + $0x378] sm:$0xff]  ;;  %v1706_v47 = vcombine.low %v192_v36, %v196_v37 }
  0xa1   :  { %954 = vmatprep.subr.bf16.mxu0 %v1651_v48  ;;  %995 = vmatprep.subr.bf16.mxu1 %v1653_v49  ;;  %v1708_v48 = vcombine.low %v193_v38, %v197_v39  ;;  %v1715_v49 = vcombine.high %v200_v43, %v204_v44  ;;  %v1717_v50 = vcombine.high %v201_v45, %v205_v46  ;;  %v1903_v36 = vld [vmem:[#allocation5 + $0xf4] ss:$8 sps:$4 sm:$0xff]   ;;  %v1901_v37 = vld [vmem:[#allocation5 + $0xf0] ss:$8 sps:$4 sm:$0xff]   ;;  %v1904_v38 = vld [vmem:[#allocation7 + $0x40] sm:$0xff]  }
  0xa2   :  { %v1905_v39 = vld [vmem:[#allocation7] sm:$0xff]  }
  0xa4   :  { %955 = vmatpush1.bf16.msra.mxu0 %v1650_v55  ;;  %996 = vmatpush1.bf16.msra.mxu1 %v1652_v56  ;;  %v213_v55 = vld [vmem:[#allocation2 + $0x3b8] sm:$0xff]  ;;  %v1714_v56 = vcombine.low %v200_v43, %v204_v44 }
  0xa5   :  { %956 = vmatprep.subr.bf16.mxu0 %v1659_v57  ;;  %997 = vmatprep.subr.bf16.mxu1 %v1661_v58  ;;  %v1716_v57 = vcombine.low %v201_v45, %v205_v46  ;;  %v1723_v58 = vcombine.high %v208_v51, %v212_v52  ;;  %v1725_v59 = vcombine.high %v209_v54, %v213_v55  ;;  %v1910_v43 = vld [vmem:[#allocation7 + $0x58] sm:$0xff]   ;;  %v1912_v45 = vld [vmem:[#allocation7 + $0x60] sm:$0xff]  }
  0xa6   :  { %v1911_v44 = vld [vmem:[#allocation7 + $0x18] sm:$0xff]   ;;  %v1913_v46 = vld [vmem:[#allocation7 + $0x20] sm:$0xff]  }
  0xa8   :  { %957 = vmatpush1.bf16.msra.mxu0 %v1658_v0  ;;  %998 = vmatpush1.bf16.msra.mxu1 %v1660_v1  ;;  %v221_v0 = vld [vmem:[#allocation2 + $0x3f8] sm:$0xff]  ;;  %v1722_v1 = vcombine.low %v208_v51, %v212_v52 }
  0xa9   :  { %958 = vmatprep.subr.bf16.mxu0 %v1667_v2  ;;  %999 = vmatprep.subr.bf16.mxu1 %v1669_v3  ;;  %v1724_v2 = vcombine.low %v209_v54, %v213_v55  ;;  %v1731_v3 = vcombine.high %v216_v60, %v220_v62  ;;  %v1733_v4 = vcombine.high %v217_v63, %v221_v0  ;;  %v1034_v60 = vlaneseq }
  0xaa   :  { %v1732_v6 = vcombine.low %v217_v63, %v221_v0  ;;  %v1032_v0 = vld [vmem:[%s2189_s2] sm:$0x3] }
  0xab   :  { %v1035_v62 = vshrl.u32 %v1034_v60, 7 }
  0xac   :  { %959 = vmatpush1.bf16.msra.mxu0 %v1666_v8  ;;  %1000 = vmatpush1.bf16.msra.mxu1 %v1668_v9  ;;  %v1858_v8 = vld [vmem:[#allocation5 + $0x4] ss:$8 sps:$4 sm:$0xff]   ;;  %v1861_v9 = vld [vmem:[#allocation5 + $0x14] ss:$8 sps:$4 sm:$0xff]  }
  0xad   :  { %960 = vmatprep.subr.bf16.mxu0 %v1675_v10  ;;  %1001 = vmatprep.subr.bf16.mxu1 %v1677_v11  ;;  %v1859_v10 = vld [vmem:[#allocation5 + $0x10] ss:$8 sps:$4 sm:$0xff]   ;;  %v1864_v11 = vld [vmem:[#allocation5 + $0x24] ss:$8 sps:$4 sm:$0xff]   ;;  %v1036_v63 = vsub.s32 0, %v1035_v62 }
  0xb0   :  { %961 = vmatpush1.bf16.msra.mxu0 %v1674_v17  ;;  %1002 = vmatpush1.bf16.msra.mxu1 %v1676_v18  ;;  %v1868_v17 = vld [vmem:[#allocation5 + $0x40] ss:$8 sps:$4 sm:$0xff]   ;;  %v1871_v18 = vld [vmem:[#allocation5 + $0x50] ss:$8 sps:$4 sm:$0xff]  }
  0xb1   :  { %962 = vmatprep.subr.bf16.mxu0 %v1683_v19  ;;  %1003 = vmatprep.subr.bf16.mxu1 %v1685_v20  ;;  %v1876_v19 = vld [vmem:[#allocation5 + $0x64] ss:$8 sps:$4 sm:$0xff]   ;;  %v1874_v20 = vld [vmem:[#allocation5 + $0x60] ss:$8 sps:$4 sm:$0xff]  }
  0xb4   :  { %963 = vmatpush1.bf16.msra.mxu0 %v1682_v53  ;;  %1004 = vmatpush1.bf16.msra.mxu1 %v1684_v25  ;;  %v1885_v53 = vld [vmem:[#allocation5 + $0x94] ss:$8 sps:$4 sm:$0xff]   ;;  %v1883_v25 = vld [vmem:[#allocation5 + $0x90] ss:$8 sps:$4 sm:$0xff]  }
  0xb5   :  { %964 = vmatprep.subr.bf16.mxu0 %v1691_v26  ;;  %1005 = vmatprep.subr.bf16.mxu1 %v1693_v27  ;;  %v1888_v26 = vld [vmem:[#allocation5 + $0xa4] ss:$8 sps:$4 sm:$0xff]   ;;  %v1886_v27 = vld [vmem:[#allocation5 + $0xa0] ss:$8 sps:$4 sm:$0xff]  }
  0xb8   :  { %965 = vmatpush1.bf16.msra.mxu0 %v1690_v32  ;;  %1006 = vmatpush1.bf16.msra.mxu1 %v1692_v33  ;;  %v1897_v32 = vld [vmem:[#allocation5 + $0xd4] ss:$8 sps:$4 sm:$0xff]   ;;  %v1895_v33 = vld [vmem:[#allocation5 + $0xd0] ss:$8 sps:$4 sm:$0xff]  }
  0xb9   :  { %966 = vmatprep.subr.bf16.mxu0 %v1699_v34  ;;  %1007 = vmatprep.subr.bf16.mxu1 %v1701_v35  ;;  %v1900_v34 = vld [vmem:[#allocation5 + $0xe4] ss:$8 sps:$4 sm:$0xff]   ;;  %v1898_v35 = vld [vmem:[#allocation5 + $0xe0] ss:$8 sps:$4 sm:$0xff]  }
  0xbc   :  { %967 = vmatpush1.bf16.msra.mxu0 %v1698_v40  ;;  %1008 = vmatpush1.bf16.msra.mxu1 %v1700_v41  ;;  %v1906_v40 = vld [vmem:[#allocation7 + $0x48] sm:$0xff]  }
  0xbd   :  { %968 = vmatprep.subr.bf16.mxu0 %v1707_v61  ;;  %1009 = vmatprep.subr.bf16.mxu1 %v1709_v42  ;;  %v1907_v41 = vld [vmem:[#allocation7 + $0x8] sm:$0xff]   ;;  %v1908_v61 = vld [vmem:[#allocation7 + $0x50] sm:$0xff]  }
  0xbe   :  { %v1909_v42 = vld [vmem:[#allocation7 + $0x10] sm:$0xff]  }
  0xc0   :  { %969 = vmatpush1.bf16.msra.mxu0 %v1706_v47  ;;  %1010 = vmatpush1.bf16.msra.mxu1 %v1708_v48  ;;  %v1914_v47 = vld [vmem:[#allocation7 + $0x68] sm:$0xff]  }
  0xc1   :  { %970 = vmatprep.subr.bf16.mxu0 %v1715_v49  ;;  %1011 = vmatprep.subr.bf16.mxu1 %v1717_v50  ;;  %v1915_v48 = vld [vmem:[#allocation7 + $0x28] sm:$0xff]  }
  0xc4   :  { %971 = vmatpush1.bf16.msra.mxu0 %v1714_v56  ;;  %1012 = vmatpush1.bf16.msra.mxu1 %v1716_v57 }
  0xc5   :  { %972 = vmatprep.subr.bf16.mxu0 %v1723_v58  ;;  %1013 = vmatprep.subr.bf16.mxu1 %v1725_v59 }
  0xc8   :  { %973 = vmatpush1.bf16.msra.mxu0 %v1722_v1  ;;  %1014 = vmatpush1.bf16.msra.mxu1 %v1724_v2  ;;  %v1040_v1 = vsub.s32 1, %v1035_v62 }
  0xc9   :  { %974 = vmatprep.subr.bf16.mxu0 %v1731_v3  ;;  %1015 = vmatprep.subr.bf16.mxu1 %v1733_v4 }
  0xcc   :  { %975 = vmatpush1.bf16.msra.mxu0 %v1730_v5  ;;  %1016 = vmatpush1.bf16.msra.mxu1 %v1732_v6  ;;  %v1037_v5 = vrot.slane %v1032_v0, %v1036_v63 }
  0xcd   :  { %1254 = vmatprep.subr.bf16.mxu0 %v1858_v8  ;;  %1792 = vmatprep.subr.bf16.mxu1 %v1904_v38  ;;  %v1920_v38 = vld [vmem:[#allocation8] sm:$0xff]  }
  0xcf   :  { %977 = vmatmul.mubr.bf16.vlgmr.msra.gmra.mrb[4].mxu0 %v2155_v15  ;;  %1018 = vmatmul.mubr.bf16.vlgmr.msra.gmra.mrb[4].mxu1 %v2155_v15  ;;  %v1873_v15 = vld [vmem:[#allocation5 + $0x54] ss:$8 sps:$4 sm:$0xff]  }
  0xd0   :  { %1255 = vmatpush1.bf16.msra.mxu0 %v1856_v7  ;;  %1793 = vmatpush3.bf16.msra.mxu1 %v1905_v39 }
  0xd1   :  { %1256 = vmatprep.subr.bf16.mxu0 %v1861_v9  ;;  %1794 = vmatprep.subr.bf16.mxu1 %v1906_v40  ;;  %v1041_v9 = vrot.slane %v1032_v0, %v1040_v1  ;;  %v1921_v40 = vld [vmem:[#allocation8 + $0x8] sm:$0xff]  }
  0xd4   :  { %1257 = vmatpush1.bf16.msra.mxu0 %v1859_v10  ;;  %1795 = vmatpush3.bf16.msra.mxu1 %v1907_v41  ;;  %v1922_v41 = vld [vmem:[#allocation8 + $0x10] sm:$0xff]  }
  0xd5   :  { %1258 = vmatprep.subr.bf16.mxu0 %v1864_v11  ;;  %1796 = vmatprep.subr.bf16.mxu1 %v1908_v61  ;;  %v1923_v61 = vld [vmem:[#allocation8 + $0x18] sm:$0xff]  }
  0xd8   :  { %1259 = vmatpush1.bf16.msra.mxu0 %v1862_v12  ;;  %1797 = vmatpush3.bf16.msra.mxu1 %v1909_v42  ;;  %v1924_v42 = vld [vmem:[#allocation8 + $0x20] sm:$0xff]  }
  0xd9   :  { %1260 = vmatprep.subr.bf16.mxu0 %v1867_v13  ;;  %1798 = vmatprep.subr.bf16.mxu1 %v1910_v43  ;;  %v1925_v43 = vld [vmem:[#allocation8 + $0x28] sm:$0xff]  }
  0xdc   :  { %1261 = vmatpush1.bf16.msra.mxu0 %v1865_v14  ;;  %1799 = vmatpush3.bf16.msra.mxu1 %v1911_v44  ;;  %v1926_v44 = vld [vmem:[#allocation8 + $0x30] sm:$0xff]  }
  0xdd   :  { %1262 = vmatprep.subr.bf16.mxu0 %v1870_v16  ;;  %1800 = vmatprep.subr.bf16.mxu1 %v1912_v45  ;;  %v1927_v45 = vld [vmem:[#allocation8 + $0x38] sm:$0xff]  }
  0xe0   :  { %1263 = vmatpush1.bf16.msra.mxu0 %v1868_v17  ;;  %1801 = vmatpush3.bf16.msra.mxu1 %v1913_v46 }
  0xe1   :  { %1264 = vmatprep.subr.bf16.mxu0 %v1873_v15  ;;  %1802 = vmatprep.subr.bf16.mxu1 %v1914_v47  ;;  %v1766_v47 = vld [vmem:[%s2189_s2 + $0x4] ss:$0 sm:$0xff] }
  0xe4   :  { %1265 = vmatpush1.bf16.msra.mxu0 %v1871_v18  ;;  %1803 = vmatpush3.bf16.msra.mxu1 %v1915_v48 }
  0xe5   :  { %1266 = vmatprep.subr.bf16.mxu0 %v1876_v19 }
  0xe8   :  { %1267 = vmatpush1.bf16.msra.mxu0 %v1874_v20 }
  0xe9   :  { %1268 = vmatprep.subr.bf16.mxu0 %v1879_v21 }
  0xec   :  { %1269 = vmatpush1.bf16.msra.mxu0 %v1877_v22  ;;  %v1916_v22 = vld [vmem:[#allocation7 + $0x70] sm:$0xff]  }
  0xed   :  { %1270 = vmatprep.subr.bf16.mxu0 %v1882_v23  ;;  %v1917_v23 = vld [vmem:[#allocation7 + $0x30] sm:$0xff]   ;;  %1804 = vmatprep.subr.bf16.mxu1 %v1916_v22 }
  0xee   :  { %1805 = vmatpush3.bf16.msra.mxu1 %v1917_v23 }
  0xf0   :  { %1271 = vmatpush1.bf16.msra.mxu0 %v1880_v24  ;;  %v1918_v24 = vld [vmem:[#allocation7 + $0x78] sm:$0xff]  }
  0xf1   :  { %1272 = vmatprep.subr.bf16.mxu0 %v1885_v53  ;;  %v1919_v53 = vld [vmem:[#allocation7 + $0x38] sm:$0xff]   ;;  %1806 = vmatprep.subr.bf16.mxu1 %v1918_v24 }
  0xf2   :  { %1807 = vmatpush3.bf16.msra.mxu1 %v1919_v53 }
  0xf4   :  { %1273 = vmatpush1.bf16.msra.mxu0 %v1883_v25  ;;  %v2056_v25 = vmov 0.0  }
  0xf5   :  { %1274 = vmatprep.subr.bf16.mxu0 %v1888_v26  ;;  %1823 = vmatprep.subr.bf16.mxu1 %v2056_v25  ;;  %v1082_v26 = vld [vmem:[%s2189_s2 + $0x2] sm:$0x3] }
  0xf8   :  { %1275 = vmatpush1.bf16.msra.mxu0 %v1886_v27  ;;  %v1087_v27 = vrot.slane %v1082_v26, %v1036_v63 }
  0xf9   :  { %1276 = vmatprep.subr.bf16.mxu0 %v1891_v28  ;;  %v1091_v28 = vrot.slane %v1082_v26, %v1040_v1 }
  0xfc   :  { %1277 = vmatpush1.bf16.msra.mxu0 %v1889_v29 }
  0xfd   :  { %1278 = vmatprep.subr.bf16.mxu0 %v1894_v30 }
 0x100   :  { %1279 = vmatpush1.bf16.msra.mxu0 %v1892_v31 }
 0x101   :  { %1280 = vmatprep.subr.bf16.mxu0 %v1897_v32 }
 0x104   :  { %1281 = vmatpush1.bf16.msra.mxu0 %v1895_v33 }
 0x105   :  { %1282 = vmatprep.subr.bf16.mxu0 %v1900_v34 }
 0x108   :  { %1283 = vmatpush1.bf16.msra.mxu0 %v1898_v35 }
 0x109   :  { %1284 = vmatprep.subr.bf16.mxu0 %v1903_v36 }
 0x10c   :  { %1285 = vmatpush1.bf16.msra.mxu0 %v1901_v37 }
 0x162   :  { %v896_v49 = vpop.f32.mrb[0].mxu0  ;;  %v937_v50 = vpop.f32.mrb[0].mxu1 }
 0x163   :  { %v898_v51 = vpop.f32.mrb[1].mxu0  ;;  %v1026_v52 = vmax.f32 %v896_v49, %v937_v50  ;;  %v939_v54 = vpop.f32.mrb[1].mxu1 }
 0x164   :  { %v900_v55 = vpop.f32.mrb[2].mxu0  ;;  %v1027_v56 = vmax.f32 %v898_v51, %v939_v54  ;;  %v941_v57 = vpop.f32.mrb[2].mxu1 }
 0x165   :  { %v901_v58 = vpop.f32.mrb[3].mxu0  ;;  %v942_v59 = vpop.f32.mrb[3].mxu1 }
 0x1a2   :  { %v978_v2 = vpop.f32.mrb[4].mxu0  ;;  %v1019_v4 = vpop.f32.mrb[4].mxu1 }
 0x1a3   :  { %v1028_v3 = vmax.f32 %v1026_v52, %v978_v2  ;;  %v980_v6 = vpop.f32.mrb[5].mxu0  ;;  %v1021_v8 = vpop.f32.mrb[5].mxu1 }
 0x1a4   :  { %v1029_v7 = vmax.f32 %v1027_v56, %v980_v6  ;;  %v982_v10 = vpop.f32.mrb[6].mxu0  ;;  %v1023_v12 = vpop.f32.mrb[6].mxu1  ;;  %v1783_v56 = vld [vmem:[%s2189_s2 + $0x5] ss:$0 sm:$0xff] }
 0x1a5   :  { %v1030_v11 = vmax.f32 %v1028_v3, %v1019_v4  ;;  %v983_v13 = vpop.f32.mrb[7].mxu0  ;;  %v1024_v16 = vpop.f32.mrb[7].mxu1 }
 0x1a6   :  { %v1031_v14 = vmax.f32 %v1029_v7, %v1021_v8 }
 0x1a7   :  { %v1044_v17 = vadd.f32 %v1037_v5, %v1030_v11 }
 0x1a8   :  { %v1045_v15 = vadd.f32 %v1041_v9, %v1031_v14 }
 0x1a9   :  { %v1046_v18 = vmax.f32 %v1044_v17, 0.0 }
 0x1aa   :  { %v1047_v19 = vmax.f32 %v1045_v15, 0.0 }
 0x1ab   :  { %v1080_v21 = vpack.c.bf16 %v1046_v18, %v1046_v18 }
 0x1ac   :  { %v1081_v20 = vpack.c.bf16 %v1047_v19, %v1047_v19 }
 0x1ae   :  { %1286 = vmatprep.mubr.bf16.mxu0 %v1081_v20 }
 0x1af   :  { %1287 = vmatmul.mubr.bf16.vlgmr.msra.gmra.mrb[8].mxu0 %v1080_v21 }
 0x282   :  { %v1288_v29 = vpop.f32.mrb[8].mxu0 }
 0x283   :  { %v1289_v30 = vadd.f32 %v1288_v29, %v1087_v27  ;;  %v1290_v31 = vpop.f32.mrb[9].mxu0 }
 0x284   :  { %v1291_v32 = vadd.f32 %v1290_v31, %v1091_v28  ;;  %v1292_v33 = vpop.f32.mrb[10].mxu0 }
 0x285   :  { %v1295_v34 = vmax.f32 %v1289_v30, 0.0  ;;  %v1293_v35 = vpop.f32.mrb[11].mxu0 }
 0x286   :  { %v1296_v36 = vmax.f32 %v1291_v32, 0.0 }
 0x287   :  { %v1329_v39 = vpack.c.bf16 %v1295_v34, %v1295_v34 }
 0x288   :  { %v1330_v37 = vpack.c.bf16 %v1296_v36, %v1296_v36 }
 0x28a   :  { %1466 = vmatprep.mubr.bf16.mxu1 %v1330_v37 }
 0x28b   :  { %1467 = vmatmul.mubr.bf16.vlgmr.msra.gmra.mrb[8].mxu1 %v1329_v39 }
 0x28c   :  { %1824 = vmatpush3.bf16.msra.mxu1 %v1920_v38  ;;  %1839 = vmatprep.mubr.msk.bf16.mxu1 %vm2057_vm0, %v2056_v25 }
 0x28d   :  { %1825 = vmatprep.subr.bf16.mxu1 %v2056_v25 }
 0x290   :  { %1826 = vmatpush3.bf16.msra.mxu1 %v1921_v40 }
 0x291   :  { %1827 = vmatprep.subr.bf16.mxu1 %v2056_v25 }
 0x294   :  { %1828 = vmatpush3.bf16.msra.mxu1 %v1922_v41 }
 0x295   :  { %1829 = vmatprep.subr.bf16.mxu1 %v2056_v25 }
 0x298   :  { %1830 = vmatpush3.bf16.msra.mxu1 %v1923_v61 }
 0x299   :  { %1831 = vmatprep.subr.bf16.mxu1 %v2056_v25 }
 0x29c   :  { %1832 = vmatpush3.bf16.msra.mxu1 %v1924_v42 }
 0x29d   :  { %1833 = vmatprep.subr.bf16.mxu1 %v2056_v25 }
 0x2a0   :  { %1834 = vmatpush3.bf16.msra.mxu1 %v1925_v43 }
 0x2a1   :  { %1835 = vmatprep.subr.bf16.mxu1 %v2056_v25 }
 0x2a4   :  { %1836 = vmatpush3.bf16.msra.mxu1 %v1926_v44 }
 0x2a5   :  { %1837 = vmatprep.subr.bf16.mxu1 %v2056_v25 }
 0x2a8   :  { %1838 = vmatpush3.bf16.msra.mxu1 %v1927_v45 }
 0x35e   :  { %v1808_v46 = vpop.f32.mrb[8].mxu1 }
 0x35f   :  { %v1809_v48 = vpop.f32.mrb[9].mxu1 }
 0x360   :  { %v1810_v49 = vadd.f32 %v1809_v48, %v1808_v46  ;;  %v1811_v50 = vpop.f32.mrb[10].mxu1 }
 0x361   :  { %v1812_v51 = vpop.f32.mrb[11].mxu1 }
 0x362   :  { %v1469_v52 = vadd.f32 %v1810_v49, %v1766_v47 }
 0x364   :  { %v1474_v54 = vmax.f32 %v1469_v52, 0.0 }
 0x366   :  { %v1491_v55 = vpack.c.bf16 %v1474_v54, %v1474_v54 }
 0x368   :  { %1840 = vmatmul.mubr.bf16.vlgmr.msra.gmra.mrb[12].mxu1 %v1491_v55 }
 0x43b   :  { %v1581_v57 = vpop.f32.mrb[12].mxu1 }
 0x43c   :  { %v1582_v58 = vadd.f32 %v1783_v56, %v1581_v57  ;;  %v1841_v59 = vpop.f32.mrb[13].mxu1 }
 0x43d   :  { %v1584_v60 = vpop.f32.mrb[14].mxu1 }
 0x43e   :  { %1587 = vst [vmem:[#allocation10] sm:$0x3] %v1582_v58  ;;  %v1842_v62 = vpop.f32.mrb[15].mxu1 }
 0x43f   :  { %2027 = shalt.err (!%p2024_p8)
}
 0x440   :  { %s2028_s2 = scalar_lea.hbm %s2193_s6, 32 }
 0x441   :  { %p2029_p9 = scmp.ne.s32.totalorder %s2193_s6, %s2028_s2  ;;  %p2032_p10 = scmp.lt.u32.totalorder %s2028_s2, %s2193_s6 }
 0x443   :  { %p2034_p11 = pnand %p2032_p10, %p2029_p9 }
 0x445   :  { %2037 = shalt.err (!%p2034_p11)
}
 0x446   :  { %1597 = dma.vmem_to_hbm [thread:$0]  %s1595_s8, 32, %s2193_s6, [#allocation4]  }
 0x447   :  { %2044 = dma.done.wait [#allocation4], 32  }
 0x448   :  { %2045 = vsyncadd [#allocation4], 4294967264 }
 0x449   :  { %1601 = vsyncpa [#allocation3], 1 }
 0x44a   :  { %1602 = vsyncpa [#allocation6], 1 }
 0x44b   :  { %1603 = vsyncpa [#allocation9], 1 }
 0x44c   :  { %1604 = vsyncpa [#allocation4], 1 }

</bundles_post_ra>
